<compile_context>
chip_gen: v6e
topology: v6e:2x2x1
jax: 0.10.0
libtpu: 0.0.40
codegen_flags: <defaults>
</compile_context>

<pallas_src>
import jax
import jax.numpy as jnp
from jax.experimental import pallas as pl
from jax.experimental.pallas import tpu as pltpu


def _round_up(a, m):
    return -(-a // m) * m


def bilinear_kernel(x_ref, y_ref, wflat_ref, rsp_ref, xsp_ref, out_ref):
    # x_ref:     (TB, I1)       left input block
    # y_ref:     (TB, I2)       right input block
    # wflat_ref: (I1*I2, OP)    W[o, i, j] flattened over (i, j), transposed,
    #                           out_dim zero-padded to OP (multiple of 128)
    # rsp_ref:   (I1, I1*I2)    one-hot spread: rsp[i, i*I2 + j] = 1
    # xsp_ref:   (I2, I1*I2)    one-hot spread: xsp[j, i*I2 + j] = 1
    # out_ref:   (TB, OP)       lane-dense output block
    I1 = x_ref.shape[1]
    mxu_dtype = wflat_ref.dtype  # f32 or bf16, chosen by the wrapper

    if I1 == 1:
        # Degenerate left dim: flattened outer product == lane-broadcast multiply.
        g = x_ref[...].astype(jnp.float32) * y_ref[...].astype(jnp.float32)
    else:
        # Flattened outer product g[b, i*I2 + j] = x[b, i] * y[b, j], built
        # directly in lane layout via two spread matmuls (no 3-D intermediate).
        a = jnp.dot(x_ref[...], rsp_ref[...], preferred_element_type=jnp.float32)
        c = jnp.dot(y_ref[...], xsp_ref[...], preferred_element_type=jnp.float32)
        g = a * c                                            # f32, VPU

    out_ref[...] = jnp.dot(g.astype(mxu_dtype), wflat_ref[...],
                           preferred_element_type=jnp.float32
                           ).astype(out_ref.dtype)


def bilinear_forward(x, y, w, *, mxu_dtype=jnp.float32, block_batch=256):
    """nn.Bilinear(in1_dim, in2_dim, out_dim, bias=False) forward.

    x: (B, I1), y: (B, I2), w: (O, I1, I2)  ->  (B, O) float32.
    """
    B, I1 = x.shape
    B2, I2 = y.shape
    assert B == B2
    O = w.shape[0]
    assert w.shape == (O, I1, I2)

    K = I1 * I2
    OP = _round_up(O, 128)                      # lane-dense output block
    tb = min(block_batch, _round_up(B, 8))      # batch tile (multiple of 8)
    b_pad = _round_up(B, tb)

    # ---- plain-JAX glue: pad batch, flatten/transpose the weight ----
    x_p = x.astype(mxu_dtype)
    y_p = y.astype(mxu_dtype)
    if b_pad != B:
        x_p = jnp.pad(x_p, ((0, b_pad - B), (0, 0)))   # zero rows, sliced off later
        y_p = jnp.pad(y_p, ((0, b_pad - B), (0, 0)))

    w_flat = jnp.transpose(w.reshape(O, K), (1, 0))                      # (K, O)
    w_flat = jnp.pad(w_flat, ((0, 0), (0, OP - O))).astype(mxu_dtype)    # (K, OP)

    # Constant one-hot spread matrices (exact in both bf16 and f32).
    k = jnp.arange(K)
    rsp = (k[None, :] // I2 == jnp.arange(I1)[:, None]).astype(mxu_dtype)  # (I1, K)
    xsp = (k[None, :] % I2 == jnp.arange(I2)[:, None]).astype(mxu_dtype)   # (I2, K)

    # TODO(synk): add grid axes over out_dim / the contraction dim (K = I1*I2)
    # if either grows beyond a few thousand; for ttnet-sized units the whole
    # weight comfortably stays VMEM-resident.
    out_padded = pl.pallas_call(
        bilinear_kernel,
        out_shape=jax.ShapeDtypeStruct((b_pad, OP), jnp.float32),
        grid_spec=pltpu.PrefetchScalarGridSpec(
            num_scalar_prefetch=0,
            grid=(b_pad // tb,),
            in_specs=[
                pl.BlockSpec((tb, I1), lambda b: (b, 0)),   # x: blocked on batch
                pl.BlockSpec((tb, I2), lambda b: (b, 0)),   # y: blocked on batch
                pl.BlockSpec((K, OP), lambda b: (0, 0)),    # weight / spreads:
                pl.BlockSpec((I1, K), lambda b: (0, 0)),    #   constant index_map
                pl.BlockSpec((I2, K), lambda b: (0, 0)),    #   -> VMEM-resident
            ],
            out_specs=pl.BlockSpec((tb, OP), lambda b: (b, 0)),
        ),
        compiler_params=pltpu.CompilerParams(
            dimension_semantics=("parallel",)),   # shard batch over v7x's 2 TCs
    )(x_p, y_p, w_flat, rsp, xsp)

    return out_padded[:B, :O]


def bilinear_reference(x, y, w):
    """Pure-JAX reference mirroring torch.nn.Bilinear (bias=False) exactly."""
    return jnp.einsum('bi,oij,bj->bo', x.astype(jnp.float32), w,
                      y.astype(jnp.float32),
                      precision=jax.lax.Precision.HIGHEST)


if __name__ == "__main__":
    key = jax.random.PRNGKey(0)
    k1, k2, k3, k4, k5, k6, k7 = jax.random.split(key, 7)

    # --- single BilinearUnit at ttnet middle-unit shapes (grid of 2 batch tiles) ---
    batch, in1_dim, in2_dim, out_dim = 256, 32, 16, 32
    x = jax.random.normal(k1, (batch, in1_dim), dtype=jnp.float32)
    y = jax.random.normal(k2, (batch, in2_dim), dtype=jnp.float32)
    w = 0.1 * jax.random.normal(k3, (out_dim, in1_dim, in2_dim), dtype=jnp.float32)

    ref = bilinear_reference(x, y, w)

    out = jax.block_until_ready(
        bilinear_forward(x, y, w, mxu_dtype=jnp.float32, block_batch=128))
    assert out.shape == (batch, out_dim)
    err_f32 = jnp.max(jnp.abs(out - ref))
    assert jnp.allclose(out, ref, rtol=5e-4, atol=5e-3), (
        f"f32 mismatch: max abs err {err_f32}")

    # bf16-at-the-MXU-boundary path (preferred on v6e/v7x), f32 accumulation.
    out_bf16 = jax.block_until_ready(
        bilinear_forward(x, y, w, mxu_dtype=jnp.bfloat16, block_batch=128))
    err_bf16 = jnp.max(jnp.abs(out_bf16 - ref))
    assert jnp.allclose(out_bf16, ref, rtol=5e-2, atol=1e-1), (
        f"bf16 mismatch: max abs err {err_bf16}")

    # --- ttnet-style chain of BilinearUnits: exercises in1_dim=1 (res0 = ones)
    #     and the lane-padded num_classes=10 output ---
    feat_dim, depth, hid_dim, num_classes = 16, 3, 32, 10
    xs = jax.random.normal(k4, (batch, feat_dim, depth), dtype=jnp.float32)
    w_first = 0.1 * jax.random.normal(k5, (hid_dim, 1, feat_dim), dtype=jnp.float32)
    w_mid = 0.1 * jax.random.normal(k6, (hid_dim, hid_dim, feat_dim), dtype=jnp.float32)
    w_last = 0.1 * jax.random.normal(k7, (num_classes, hid_dim, feat_dim),
                                     dtype=jnp.float32)

    res = jnp.ones((batch, 1), jnp.float32)
    res_ref = res
    for t, wt in enumerate([w_first, w_mid, w_last]):
        res = bilinear_forward(res, xs[:, :, t], wt)
        res_ref = bilinear_reference(res_ref, xs[:, :, t], wt)
    res = jax.block_until_ready(res)
    assert res.shape == (batch, num_classes)
    err_chain = jnp.max(jnp.abs(res - res_ref))
    assert jnp.allclose(res, res_ref, rtol=5e-4, atol=5e-3), (
        f"chain mismatch: max abs err {err_chain}")

    print("KERNEL_OK")
</pallas_src>

<mosaic_0001>
module attributes {stable_mosaic.version = 11 : i64} {
  func.func @bilinear_kernel(%arg0: i32, %arg1: memref<128x32xf32, #tpu.memory_space<vmem>>, %arg2: memref<128x16xf32, #tpu.memory_space<vmem>>, %arg3: memref<512x128xf32, #tpu.memory_space<vmem>>, %arg4: memref<32x512xf32, #tpu.memory_space<vmem>>, %arg5: memref<16x512xf32, #tpu.memory_space<vmem>>, %arg6: memref<128x128xf32, #tpu.memory_space<vmem>>) attributes {dimension_semantics = [#tpu.dimension_semantics<parallel>], iteration_bounds = array<i64: 2>, scalar_prefetch = 0 : i64, scratch_operands = 0 : i64, tpu.core_type = #tpu.core_type<tc>, window_params = [{transform_indices = @transform_0, window_bounds = array<i64: 128, 32>}, {transform_indices = @transform_1, window_bounds = array<i64: 128, 16>}, {pipeline_mode = #tpu.pipeline_mode<synchronous>, transform_indices = @transform_2, window_bounds = array<i64: 512, 128>}, {pipeline_mode = #tpu.pipeline_mode<synchronous>, transform_indices = @transform_3, window_bounds = array<i64: 32, 512>}, {pipeline_mode = #tpu.pipeline_mode<synchronous>, transform_indices = @transform_4, window_bounds = array<i64: 16, 512>}, {transform_indices = @transform_5, window_bounds = array<i64: 128, 128>}]} {
    %c0 = arith.constant 0 : index
    %c0_0 = arith.constant 0 : index
    %0 = vector.load %arg1[%c0, %c0_0] : memref<128x32xf32, #tpu.memory_space<vmem>>, vector<128x32xf32>
    %c0_1 = arith.constant 0 : index
    %c0_2 = arith.constant 0 : index
    %1 = vector.load %arg4[%c0_1, %c0_2] : memref<32x512xf32, #tpu.memory_space<vmem>>, vector<32x512xf32>
    %cst = arith.constant dense<0.000000e+00> : vector<128x512xf32>
    %2 = tpu.matmul %0, %1, %cst {dimension_numbers = #tpu.dot_dimension_numbers<[1], [0], [0], [1], [0, 0, 1, 1], [], []>} : vector<128x32xf32>, vector<32x512xf32>, vector<128x512xf32> -> vector<128x512xf32>
    %c0_3 = arith.constant 0 : index
    %c0_4 = arith.constant 0 : index
    %3 = vector.load %arg2[%c0_3, %c0_4] : memref<128x16xf32, #tpu.memory_space<vmem>>, vector<128x16xf32>
    %c0_5 = arith.constant 0 : index
    %c0_6 = arith.constant 0 : index
    %4 = vector.load %arg5[%c0_5, %c0_6] : memref<16x512xf32, #tpu.memory_space<vmem>>, vector<16x512xf32>
    %cst_7 = arith.constant dense<0.000000e+00> : vector<128x512xf32>
    %5 = tpu.matmul %3, %4, %cst_7 {dimension_numbers = #tpu.dot_dimension_numbers<[1], [0], [0], [1], [0, 0, 1, 1], [], []>} : vector<128x16xf32>, vector<16x512xf32>, vector<128x512xf32> -> vector<128x512xf32>
    %6 = arith.mulf %2, %5 : vector<128x512xf32>
    %c0_8 = arith.constant 0 : index
    %c0_9 = arith.constant 0 : index
    %7 = vector.load %arg3[%c0_8, %c0_9] : memref<512x128xf32, #tpu.memory_space<vmem>>, vector<512x128xf32>
    %cst_10 = arith.constant dense<0.000000e+00> : vector<128x128xf32>
    %8 = tpu.matmul %6, %7, %cst_10 {dimension_numbers = #tpu.dot_dimension_numbers<[1], [0], [0], [1], [0, 0, 1, 1], [], []>} : vector<128x512xf32>, vector<512x128xf32>, vector<128x128xf32> -> vector<128x128xf32>
    %c0_11 = arith.constant 0 : index
    %c0_12 = arith.constant 0 : index
    %9 = vector.load %arg6[%c0_11, %c0_12] : memref<128x128xf32, #tpu.memory_space<vmem>>, vector<128x128xf32>
    tpu.vector_store %arg6[%c0_11, %c0_12], %8 {strides = array<i32>} : memref<128x128xf32, #tpu.memory_space<vmem>>, vector<128x128xf32>,
    return
  }
  func.func @transform_0(%arg0: i32) -> (i32, i32) {
    %c0_i32 = arith.constant 0 : i32
    %c0_i32_0 = arith.constant 0 : i32
    return %arg0, %c0_i32 : i32, i32
  }
  func.func @transform_1(%arg0: i32) -> (i32, i32) {
    %c0_i32 = arith.constant 0 : i32
    %c0_i32_0 = arith.constant 0 : i32
    return %arg0, %c0_i32 : i32, i32
  }
  func.func @transform_2(%arg0: i32) -> (i32, i32) {
    %c0_i32 = arith.constant 0 : i32
    %c0_i32_0 = arith.constant 0 : i32
    %c0_i32_1 = arith.constant 0 : i32
    return %c0_i32, %c0_i32_0 : i32, i32
  }
  func.func @transform_3(%arg0: i32) -> (i32, i32) {
    %c0_i32 = arith.constant 0 : i32
    %c0_i32_0 = arith.constant 0 : i32
    %c0_i32_1 = arith.constant 0 : i32
    return %c0_i32, %c0_i32_0 : i32, i32
  }
  func.func @transform_4(%arg0: i32) -> (i32, i32) {
    %c0_i32 = arith.constant 0 : i32
    %c0_i32_0 = arith.constant 0 : i32
    %c0_i32_1 = arith.constant 0 : i32
    return %c0_i32, %c0_i32_0 : i32, i32
  }
  func.func @transform_5(%arg0: i32) -> (i32, i32) {
    %c0_i32 = arith.constant 0 : i32
    %c0_i32_0 = arith.constant 0 : i32
    return %arg0, %c0_i32 : i32, i32
  }
}

</mosaic_0001>

<bundles_post_ra>
// kernel: tpu_custom_call.1
= control target key start
LH: loop header
LB: loop body
LE: loop exit
PB: predicated region body
PF: predicated region fallthrough
CT: control target
= control target key end

     0   :  { %10 = vsyncpa [#allocation3], 0  ;;  %s2744_s0 = inlined_call_operand.vmem [shape: f32[256,32], index: 0, kind: input, shape index: {}]   ;;  %s2745_s1 = inlined_call_operand.vmem [shape: f32[256,16], index: 1, kind: input, shape index: {}]   ;;  %s2746_s2 = inlined_call_operand.vmem [shape: f32[512,128], index: 2, kind: input, shape index: {}]   ;;  %s2747_s3 = inlined_call_operand.hbm [shape: f32[32,512], index: 3, kind: input, shape index: {}]   ;;  %s2748_s4 = inlined_call_operand.vmem [shape: f32[16,512], index: 4, kind: input, shape index: {}]   ;;  %s2749_s5 = inlined_call_operand.hbm [shape: f32[256,128], index: 5, kind: output, shape index: {}]  }
   0x1   :  { %11 = vsyncpa [#allocation4], 0 }
   0x2   :  { %13 = vsyncpa [#allocation4 + $0x1], 0  ;;  %s2020_s18 = smov 0   ;;  %s2022_s19 = smov 0  }
   0x3   :  { %s2024_s20 = smov 0   ;;  %s2026_s21 = smov 0  }
   0x4 LB: > { %s2041_s22 = sadd.s32 4294967295, %s1981_s21   ;;  %s1595_s23 = sadd.s32 4294967294, %s1981_s21   ;;  %s1981_s21 = sphi %s2026_s21, %s2785_s21   ;;  %s1977_s20 = sphi %s2024_s20, %s2784_s20   ;;  %s1973_s19 = sphi %s2022_s19, %s2783_s19   ;;  %s1969_s18 = sphi %s2020_s18, %s2782_s18  }
   0x5   : > { %s2045_s24 = sadd.s32 1, %s1981_s21   ;;  %s141_s25 = sadd.s32 1, %s1977_s20 }
   0x6   : > { %s138_s26 = ssub.s32 %s1981_s21, %s2045_s24  ;;  %p151_p0 = scmp.ne.s32.totalorder %s1977_s20, %s1973_s19 }
   0x7   : > { %p139_p1 = scmp.eq.s32.totalorder %s138_s26, 0  ;;  %p152_p2 = scmp.eq.s32.totalorder %s2041_s22, 1 }
   0x8   : > { %p157_p3 = scmp.ne.s32.totalorder %s1973_s19, %s1969_s18  ;;  %p158_p4 = scmp.eq.s32.totalorder %s1595_s23, 1 }
   0x9   : > { %s2056_s27 = scalar_select %p139_p1, %s1977_s20, %s141_s25  }
   0xa   : > { %p2058_p5 = por %p152_p2, %p151_p0  ;;  %p2062_p6 = por %p158_p4, %p157_p3 }
   0xb   : > { %p1596_p7 = scmp.ge.s32.totalorder %s1981_s21, 1  ;;  %p165_p8 = scmp.lt.s32.totalorder %s1981_s21, 3 }
   0xc   : > { %s2751_s29 = scalar_select %p2062_p6, 1, 0 }
   0xd   : > { %p1850_p9 = scmp.eq.s32.totalorder %s2041_s22, 0  ;;  %p2069_p10 = pnand %p1596_p7, %p165_p8 }
   0xe   : > { %s1983_s6 = smov [#allocation2]  }
   0xf   : > { %s180_s7 = sshll.u32 %s1983_s6, 4  ;;  %p1842_p11 = pneg %p2069_p10  ;;  %s181_s7 = int_to_ptr.vmem [resolvable:$true] %s180_s7 }
  0x10   : > { %s1902_s8 = scalar_lea.vmem %s181_s7, 2048  ;;  %p1910_p3 = scmp.lt.s32.totalorder %s181_s7, %s181_s7 }
  0x11   : > { %p1843_p12 = pnand %p1850_p9, %p1842_p11  ;;  %p1903_p0 = scmp.ne.s32.totalorder %s181_s7, %s1902_s8 }
  0x12   : > { %p1911_p4 = scmp.lt.s32.totalorder %s1902_s8, %s1902_s8 }
  0x13   : > { %p1893_p13 = pneg %p1843_p12 }
  0x14   : > { %p1912_p6 = por %p1911_p4, %p1910_p3 }
  0x15   : > { %p1905_p1 = pnand %p1903_p0, %p1893_p13 }
  0x17   : > { %p1906_p2 = pneg %p1905_p1 }
  0x19   : > { %p1913_p7 = pnand %p1912_p6, %p1906_p2 }
  0x1b   : > { %1916 = shalt.err (!%p1913_p7)
}
  0x1c   : > { %s1984_s9 = smov 512   ;;  %s1985_s10 = smov 32  }
  0x1d   : > { %1845 = dma.hbm_to_vmem [thread:$0]  (!%p1843_p12), %s2747_s3, 2048, %s181_s7, [#allocation3], %s1984_s9, %s1984_s9, %s1985_s10  }
  0x1e   : > { %217 = sbr.rel (%p2069_p10) target bundleno = 581 (0x245), region = 40 }
  0x23   : > { %1960 = dma.done.wait (%p1850_p9), [#allocation3], 2048  }
  0x24   : > { %1962 = vsyncadd (%p1850_p9), [#allocation3], 4294965248  ;;  %s1602_s13 = sshll.u32 %s2041_s22, 4  ;;  %v1986_v0 = vmov 0.0   ;;  %v292_v1 = vld [vmem:[#allocation2 + $0x68] sm:$0xff]  ;;  %v294_v2 = vld [vmem:[#allocation2 + $0x78] sm:$0xff] }
  0x25   : > { %408 = vmatprep.mubr.f32.mxu0 %v1986_v0  ;;  %569 = vmatprep.mubr.f32.mxu1 %v1986_v0  ;;  %p251_p6 = scmp.lt.s32.totalorder %s1602_s13, 31  ;;  %v291_v3 = vld [vmem:[#allocation2 + $0x60] sm:$0xff]  ;;  %v293_v4 = vld [vmem:[#allocation2 + $0x70] sm:$0xff]  ;;  %v288_v5 = vld [vmem:[#allocation2 + $0x48] sm:$0xff]  ;;  %vm295_vm0 = vcmask 261120   ;;  %vm690_vm1 = vcmask 130048  }
  0x26   : > { %368 = vmatprep.subr.mxu0 %v292_v1  ;;  %529 = vmatprep.subr.mxu1 %v294_v2  ;;  %v290_v6 = vld [vmem:[#allocation2 + $0x58] sm:$0xff]  ;;  %v287_v7 = vld [vmem:[#allocation2 + $0x40] sm:$0xff]  ;;  %v289_v8 = vld [vmem:[#allocation2 + $0x50] sm:$0xff]  ;;  %s1675_s16 = sshll.u32 %s2041_s22, 11 }
  0x27   : > { %s2787_s13 = smov (!%p251_p6, %s1602_s13), 31  ;;  %369 = vmatpush1.msra.mxu0 %v291_v3  ;;  %530 = vmatpush1.msra.mxu1 %v293_v4  ;;  %v284_v9 = vld [vmem:[#allocation2 + $0x28] sm:$0xff]  ;;  %v286_v10 = vld [vmem:[#allocation2 + $0x38] sm:$0xff]  ;;  %v283_v11 = vld [vmem:[#allocation2 + $0x20] sm:$0xff]  ;;  %s2697_s30 = scalar_lea.hbm %s2749_s5, %s1675_s16 }
  0x28   : > { %s1603_s14 = sshll.u32 %s2787_s13, 3  ;;  %370 = vmatprep.subr.mxu0 %v288_v5  ;;  %531 = vmatprep.subr.mxu1 %v290_v6  ;;  %v285_v12 = vld [vmem:[#allocation2 + $0x30] sm:$0xff]  ;;  %v280_v13 = vld [vmem:[#allocation2 + $0x8] sm:$0xff]  ;;  %v282_v14 = vld [vmem:[#allocation2 + $0x18] sm:$0xff]  ;;  %s1987_s13 = smov [#allocation5]  }
  0x29   : > { %s2097_s17 = scalar_lea.vmem %s2744_s0, %s1603_s14  ;;  %371 = vmatpush1.msra.mxu0 %v287_v7  ;;  %532 = vmatpush1.msra.mxu1 %v289_v8  ;;  %v279_v15 = vld [vmem:[#allocation2] sm:$0xff]  ;;  %v281_v16 = vld [vmem:[#allocation2 + $0x10] sm:$0xff]  ;;  %v687_v18 = vld [vmem:[%s2748_s4 + $0x28] sm:$0xff]  ;;  %s2204_s7 = scalar_lea.vmem %s2745_s1, %s1603_s14 }
  0x2a   : > { %372 = vmatprep.subr.mxu0 %v284_v9  ;;  %533 = vmatprep.subr.mxu1 %v286_v10  ;;  %v263_v17 = vld [vmem:[%s2097_s17] sm:$0xff]  ;;  %v689_v19 = vld [vmem:[%s2748_s4 + $0x38] sm:$0xff]  ;;  %v688_v21 = vld [vmem:[%s2748_s4 + $0x30] sm:$0xff]  ;;  %s1921_s14 = sshll.u32 %s1987_s13, 4  ;;  %s1922_s14 = int_to_ptr.vmem [resolvable:$false] %s1921_s14 }
  0x2b   : > { %373 = vmatpush1.msra.mxu0 %v283_v11  ;;  %534 = vmatpush1.msra.mxu1 %v285_v12  ;;  %v686_v20 = vld [vmem:[%s2748_s4 + $0x20] sm:$0xff]  ;;  %v264_v22 = vld [vmem:[%s2097_s17 + $0x8] sm:$0xff]  ;;  %v685_v24 = vld [vmem:[%s2748_s4 + $0x18] sm:$0xff] }
  0x2c   : > { %374 = vmatprep.subr.mxu0 %v280_v13  ;;  %535 = vmatprep.subr.mxu1 %v282_v14  ;;  %v683_v23 = vld [vmem:[%s2748_s4 + $0x8] sm:$0xff]  ;;  %v682_v25 = vld [vmem:[%s2748_s4] sm:$0xff]  ;;  %v684_v26 = vld [vmem:[%s2748_s4 + $0x10] sm:$0xff] }
  0x2d   : > { %375 = vmatpush1.msra.mxu0 %v279_v15  ;;  %536 = vmatpush1.msra.mxu1 %v281_v16  ;;  %v265_v27 = vld [vmem:[%s2097_s17 + $0x10] sm:$0xff]  ;;  %v266_v28 = vld [vmem:[%s2097_s17 + $0x18] sm:$0xff]  ;;  %v267_v29 = vld [vmem:[%s2097_s17 + $0x20] sm:$0xff] }
  0x2e   : > { %1606 = vmatmul.mubr.msk.f32.vlgmr.msra.gmra.mxu0 %vm295_vm0, %v263_v17  ;;  %1622 = vmatmul.mubr.msk.f32.vlgmr.msra.gmra.mxu1 %vm295_vm0, %v263_v17  ;;  %v268_v30 = vld [vmem:[%s2097_s17 + $0x28] sm:$0xff]  ;;  %v269_v31 = vld [vmem:[%s2097_s17 + $0x30] sm:$0xff]  ;;  %v270_v32 = vld [vmem:[%s2097_s17 + $0x38] sm:$0xff] }
  0x2f   : > { %767 = vmatprep.subr.mxu0 %v687_v18  ;;  %928 = vmatprep.subr.mxu1 %v689_v19  ;;  %v271_v33 = vld [vmem:[%s2097_s17 + $0x40] sm:$0xff]  ;;  %v272_v34 = vld [vmem:[%s2097_s17 + $0x48] sm:$0xff]  ;;  %v273_v35 = vld [vmem:[%s2097_s17 + $0x50] sm:$0xff] }
  0x30   : > { %768 = vmatpush1.msra.mxu0 %v686_v20  ;;  %929 = vmatpush1.msra.mxu1 %v688_v21  ;;  %v274_v36 = vld [vmem:[%s2097_s17 + $0x58] sm:$0xff]  ;;  %v275_v37 = vld [vmem:[%s2097_s17 + $0x60] sm:$0xff]  ;;  %v276_v38 = vld [vmem:[%s2097_s17 + $0x68] sm:$0xff] }
  0x31   : > { %414 = vmatprep.mubr.f32.mxu0 %v1986_v0  ;;  %575 = vmatprep.mubr.f32.mxu1 %v1986_v0  ;;  %v277_v39 = vld [vmem:[%s2097_s17 + $0x70] sm:$0xff]  ;;  %v278_v40 = vld [vmem:[%s2097_s17 + $0x78] sm:$0xff]  ;;  %v666_v41 = vld [vmem:[%s2204_s7] sm:$0xff]  ;;  %s1923_s17 = scalar_lea.vmem %s1922_s14, 4096 }
  0x32   : > { %1607 = vmatmul.mubr.msk.f32.gmra.mxu0 %vm295_vm0, %v264_v22  ;;  %1623 = vmatmul.mubr.msk.f32.gmra.mxu1 %vm295_vm0, %v264_v22  ;;  %v667_v42 = vld [vmem:[%s2204_s7 + $0x8] sm:$0xff]  ;;  %v668_v43 = vld [vmem:[%s2204_s7 + $0x10] sm:$0xff]  ;;  %v1156_v44 = vld [vmem:[%s2746_s2 + $0xf8] sm:$0xff] }
  0x33   : > { %420 = vmatprep.mubr.f32.mxu0 %v1986_v0  ;;  %581 = vmatprep.mubr.f32.mxu1 %v1986_v0  ;;  %v1188_v45 = vld [vmem:[%s2746_s2 + $0x1f8] sm:$0xff]  ;;  %v1155_v49 = vld [vmem:[%s2746_s2 + $0xf0] sm:$0xff]  ;;  %v670_v53 = vld [vmem:[%s2204_s7 + $0x20] sm:$0xff] }
  0x34   : > { %769 = vmatprep.subr.mxu0 %v683_v23  ;;  %930 = vmatprep.subr.mxu1 %v685_v24  ;;  %v1140_v46 = vld [vmem:[%s2746_s2 + $0x78] sm:$0xff]  ;;  %v1187_v50 = vld [vmem:[%s2746_s2 + $0x1f0] sm:$0xff]  ;;  %v1154_v54 = vld [vmem:[%s2746_s2 + $0xe8] sm:$0xff] }
  0x35   : > { %770 = vmatpush1.msra.mxu0 %v682_v25  ;;  %931 = vmatpush1.msra.mxu1 %v684_v26  ;;  %v1172_v47 = vld [vmem:[%s2746_s2 + $0x178] sm:$0xff]  ;;  %v1139_v51 = vld [vmem:[%s2746_s2 + $0x70] sm:$0xff]  ;;  %v1186_v55 = vld [vmem:[%s2746_s2 + $0x1e8] sm:$0xff] }
  0x36   : > { %1608 = vmatmul.mubr.msk.f32.gmra.mxu0 %vm295_vm0, %v265_v27  ;;  %1624 = vmatmul.mubr.msk.f32.gmra.mxu1 %vm295_vm0, %v265_v27  ;;  %v669_v48 = vld [vmem:[%s2204_s7 + $0x18] sm:$0xff]  ;;  %v1171_v52 = vld [vmem:[%s2746_s2 + $0x170] sm:$0xff]  ;;  %v1138_v56 = vld [vmem:[%s2746_s2 + $0x68] sm:$0xff] }
  0x37   : > { %426 = vmatprep.mubr.f32.mxu0 %v1986_v0  ;;  %587 = vmatprep.mubr.f32.mxu1 %v1986_v0  ;;  %v1170_v57 = vld [vmem:[%s2746_s2 + $0x168] sm:$0xff]  ;;  %v1153_v59 = vld [vmem:[%s2746_s2 + $0xe0] sm:$0xff]  ;;  %v672_v63 = vld [vmem:[%s2204_s7 + $0x30] sm:$0xff] }
  0x38   : > { %1676 = vmatprep.subr.mxu0 %v1156_v44  ;;  %1756 = vmatprep.subr.mxu1 %v1188_v45  ;;  %v671_v58 = vld [vmem:[%s2204_s7 + $0x28] sm:$0xff]  ;;  %v1185_v60 = vld [vmem:[%s2746_s2 + $0x1e0] sm:$0xff]  ;;  %v1152_v1 = vld [vmem:[%s2746_s2 + $0xd8] sm:$0xff] }
  0x39   : > { %v1137_v61 = vld [vmem:[%s2746_s2 + $0x60] sm:$0xff]  ;;  %v1184_v2 = vld [vmem:[%s2746_s2 + $0x1d8] sm:$0xff]  ;;  %v1151_v6 = vld [vmem:[%s2746_s2 + $0xd0] sm:$0xff] }
  0x3a   : > { %1609 = vmatmul.mubr.msk.f32.gmra.mxu0 %vm295_vm0, %v266_v28  ;;  %1625 = vmatmul.mubr.msk.f32.gmra.mxu1 %vm295_vm0, %v266_v28  ;;  %v1169_v62 = vld [vmem:[%s2746_s2 + $0x160] sm:$0xff]  ;;  %v1136_v3 = vld [vmem:[%s2746_s2 + $0x58] sm:$0xff]  ;;  %v1183_v7 = vld [vmem:[%s2746_s2 + $0x1d0] sm:$0xff] }
  0x3b   : > { %432 = vmatprep.mubr.f32.mxu0 %v1986_v0  ;;  %593 = vmatprep.mubr.f32.mxu1 %v1986_v0  ;;  %v1168_v4 = vld [vmem:[%s2746_s2 + $0x158] sm:$0xff]  ;;  %v1135_v8 = vld [vmem:[%s2746_s2 + $0x50] sm:$0xff]  ;;  %v674_v10 = vld [vmem:[%s2204_s7 + $0x40] sm:$0xff] }
  0x3c   : > { %v673_v5 = vld [vmem:[%s2204_s7 + $0x38] sm:$0xff]  ;;  %v1167_v9 = vld [vmem:[%s2746_s2 + $0x150] sm:$0xff]  ;;  %v1150_v11 = vld [vmem:[%s2746_s2 + $0xc8] sm:$0xff] }
  0x3d   : > { %v1182_v12 = vld [vmem:[%s2746_s2 + $0x1c8] sm:$0xff]  ;;  %v1149_v16 = vld [vmem:[%s2746_s2 + $0xc0] sm:$0xff]  ;;  %v676_v20 = vld [vmem:[%s2204_s7 + $0x50] sm:$0xff] }
  0x3e   : > { %1610 = vmatmul.mubr.msk.f32.gmra.mxu0 %vm295_vm0, %v267_v29  ;;  %1626 = vmatmul.mubr.msk.f32.gmra.mxu1 %vm295_vm0, %v267_v29  ;;  %v1134_v13 = vld [vmem:[%s2746_s2 + $0x48] sm:$0xff]  ;;  %v1181_v17 = vld [vmem:[%s2746_s2 + $0x1c0] sm:$0xff]  ;;  %v1148_v21 = vld [vmem:[%s2746_s2 + $0xb8] sm:$0xff] }
  0x3f   : > { %438 = vmatprep.mubr.f32.mxu0 %v1986_v0  ;;  %599 = vmatprep.mubr.f32.mxu1 %v1986_v0  ;;  %v1166_v14 = vld [vmem:[%s2746_s2 + $0x148] sm:$0xff]  ;;  %v1133_v18 = vld [vmem:[%s2746_s2 + $0x40] sm:$0xff]  ;;  %v1180_v22 = vld [vmem:[%s2746_s2 + $0x1b8] sm:$0xff] }
  0x40   : > { %v675_v15 = vld [vmem:[%s2204_s7 + $0x48] sm:$0xff]  ;;  %v1165_v19 = vld [vmem:[%s2746_s2 + $0x140] sm:$0xff]  ;;  %v1132_v23 = vld [vmem:[%s2746_s2 + $0x38] sm:$0xff] }
  0x41   : > { %v1164_v24 = vld [vmem:[%s2746_s2 + $0x138] sm:$0xff]  ;;  %v1147_v26 = vld [vmem:[%s2746_s2 + $0xb0] sm:$0xff] }
  0x42   : > { %1611 = vmatmul.mubr.msk.f32.gmra.mxu0 %vm295_vm0, %v268_v30  ;;  %1627 = vmatmul.mubr.msk.f32.gmra.mxu1 %vm295_vm0, %v268_v30  ;;  %v677_v25 = vld [vmem:[%s2204_s7 + $0x58] sm:$0xff]  ;;  %v1179_v27 = vld [vmem:[%s2746_s2 + $0x1b0] sm:$0xff]  ;;  %v678_v30 = vld [vmem:[%s2204_s7 + $0x60] sm:$0xff] }
  0x43   : > { %444 = vmatprep.mubr.f32.mxu0 %v1986_v0  ;;  %605 = vmatprep.mubr.f32.mxu1 %v1986_v0  ;;  %v1131_v28 = vld [vmem:[%s2746_s2 + $0x30] sm:$0xff]  ;;  %v1160_v44 = vld [vmem:[%s2746_s2 + $0x118] sm:$0xff] }
  0x44   : > { %v1163_v29 = vld [vmem:[%s2746_s2 + $0x130] sm:$0xff]  ;;  %v681_v45 = vld [vmem:[%s2204_s7 + $0x78] sm:$0xff] }
  0x46   : > { %1612 = vmatmul.mubr.msk.f32.gmra.mxu0 %vm295_vm0, %v269_v31  ;;  %1628 = vmatmul.mubr.msk.f32.gmra.mxu1 %vm295_vm0, %v269_v31  ;;  %v1146_v31 = vld [vmem:[%s2746_s2 + $0xa8] sm:$0xff] }
  0x47   : > { %450 = vmatprep.mubr.f32.mxu0 %v1986_v0  ;;  %611 = vmatprep.mubr.f32.mxu1 %v1986_v0 }
  0x4a   : > { %1613 = vmatmul.mubr.msk.f32.gmra.mxu0 %vm295_vm0, %v270_v32  ;;  %1629 = vmatmul.mubr.msk.f32.gmra.mxu1 %vm295_vm0, %v270_v32  ;;  %v1178_v32 = vld [vmem:[%s2746_s2 + $0x1a8] sm:$0xff] }
  0x4b   : > { %456 = vmatprep.mubr.f32.mxu0 %v1986_v0  ;;  %617 = vmatprep.mubr.f32.mxu1 %v1986_v0 }
  0x4e   : > { %1614 = vmatmul.mubr.msk.f32.gmra.mxu0 %vm295_vm0, %v271_v33  ;;  %1630 = vmatmul.mubr.msk.f32.gmra.mxu1 %vm295_vm0, %v271_v33  ;;  %v1130_v33 = vld [vmem:[%s2746_s2 + $0x28] sm:$0xff] }
  0x4f   : > { %462 = vmatprep.mubr.f32.mxu0 %v1986_v0  ;;  %623 = vmatprep.mubr.f32.mxu1 %v1986_v0 }
  0x52   : > { %1615 = vmatmul.mubr.msk.f32.gmra.mxu0 %vm295_vm0, %v272_v34  ;;  %1631 = vmatmul.mubr.msk.f32.gmra.mxu1 %vm295_vm0, %v272_v34  ;;  %v1162_v34 = vld [vmem:[%s2746_s2 + $0x128] sm:$0xff] }
  0x53   : > { %468 = vmatprep.mubr.f32.mxu0 %v1986_v0  ;;  %629 = vmatprep.mubr.f32.mxu1 %v1986_v0 }
  0x56   : > { %1616 = vmatmul.mubr.msk.f32.gmra.mxu0 %vm295_vm0, %v273_v35  ;;  %1632 = vmatmul.mubr.msk.f32.gmra.mxu1 %vm295_vm0, %v273_v35  ;;  %v679_v35 = vld [vmem:[%s2204_s7 + $0x68] sm:$0xff] }
  0x57   : > { %474 = vmatprep.mubr.f32.mxu0 %v1986_v0  ;;  %635 = vmatprep.mubr.f32.mxu1 %v1986_v0 }
  0x5a   : > { %1617 = vmatmul.mubr.msk.f32.gmra.mxu0 %vm295_vm0, %v274_v36  ;;  %1633 = vmatmul.mubr.msk.f32.gmra.mxu1 %vm295_vm0, %v274_v36  ;;  %v1145_v36 = vld [vmem:[%s2746_s2 + $0xa0] sm:$0xff] }
  0x5b   : > { %480 = vmatprep.mubr.f32.mxu0 %v1986_v0  ;;  %641 = vmatprep.mubr.f32.mxu1 %v1986_v0 }
  0x5e   : > { %1618 = vmatmul.mubr.msk.f32.gmra.mxu0 %vm295_vm0, %v275_v37  ;;  %1634 = vmatmul.mubr.msk.f32.gmra.mxu1 %vm295_vm0, %v275_v37  ;;  %v1177_v37 = vld [vmem:[%s2746_s2 + $0x1a0] sm:$0xff] }
  0x5f   : > { %486 = vmatprep.mubr.f32.mxu0 %v1986_v0  ;;  %647 = vmatprep.mubr.f32.mxu1 %v1986_v0 }
  0x62   : > { %1619 = vmatmul.mubr.msk.f32.gmra.mxu0 %vm295_vm0, %v276_v38  ;;  %1635 = vmatmul.mubr.msk.f32.gmra.mxu1 %vm295_vm0, %v276_v38  ;;  %v1129_v38 = vld [vmem:[%s2746_s2 + $0x20] sm:$0xff] }
  0x63   : > { %492 = vmatprep.mubr.f32.mxu0 %v1986_v0  ;;  %653 = vmatprep.mubr.f32.mxu1 %v1986_v0 }
  0x66   : > { %1620 = vmatmul.mubr.msk.f32.gmra.mxu0 %vm295_vm0, %v277_v39  ;;  %1636 = vmatmul.mubr.msk.f32.gmra.mxu1 %vm295_vm0, %v277_v39  ;;  %v1161_v39 = vld [vmem:[%s2746_s2 + $0x120] sm:$0xff] }
  0x67   : > { %498 = vmatprep.mubr.f32.mxu0 %v1986_v0  ;;  %659 = vmatprep.mubr.f32.mxu1 %v1986_v0 }
  0x6a   : > { %1621 = vmatmul.mubr.msk.f32.gmra.mxu0 %vm295_vm0, %v278_v40  ;;  %1637 = vmatmul.mubr.msk.f32.gmra.mxu1 %vm295_vm0, %v278_v40  ;;  %v680_v40 = vld [vmem:[%s2204_s7 + $0x70] sm:$0xff]  ;;  %s247_s7 = sand.u32 1, %s1973_s19  }
  0x6b   : > { %803 = vmatprep.mubr.f32.mxu0 %v1986_v0  ;;  %964 = vmatprep.mubr.f32.mxu1 %v1986_v0  ;;  %s1601_s12 = sshll.u32 %s247_s7, 7  ;;  %s2704_s22 = scalar_lea.sflag [#allocation4], %s247_s7 }
  0x6c   : > { %s2675_s15 = scalar_lea.vmem [#allocation5], %s1601_s12 }
  0x6d   : > { %s1509_s23 = sshll.u32 %s2675_s15, 4  ;;  %s2699_s23 = int_to_ptr.vmem [resolvable:$true] %s1509_s23 }
  0x6e   : > { %1638 = vmatmul.mubr.msk.f32.vlgmr.msra.gmra.mxu0 %vm690_vm1, %v666_v41  ;;  %1654 = vmatmul.mubr.msk.f32.vlgmr.msra.gmra.mxu1 %vm690_vm1, %v666_v41  ;;  %v1144_v41 = vld [vmem:[%s2746_s2 + $0x98] sm:$0xff]  ;;  %s1917_s6 = scalar_lea.vmem %s2699_s23, 2048  ;;  %p1924_p11 = scmp.lt.s32.totalorder %s2699_s23, %s1922_s14 }
  0x6f   : > { %809 = vmatprep.mubr.f32.mxu0 %v1986_v0  ;;  %970 = vmatprep.mubr.f32.mxu1 %v1986_v0  ;;  %p1918_p8 = scmp.ne.s32.totalorder %s2699_s23, %s1917_s6  ;;  %p1925_p12 = scmp.lt.s32.totalorder %s1923_s17, %s1917_s6 }
  0x70   : > { %1677 = vmatpush3.msra.mxu0 %v1140_v46  ;;  %1757 = vmatpush3.msra.mxu1 %v1172_v47  ;;  %v1143_v46 = vld [vmem:[%s2746_s2 + $0x90] sm:$0xff] }
  0x71   : > { %1678 = vmatprep.subr.mxu0 %v1155_v49  ;;  %1758 = vmatprep.subr.mxu1 %v1187_v50  ;;  %v1175_v47 = vld [vmem:[%s2746_s2 + $0x190] sm:$0xff]  ;;  %v1142_v49 = vld [vmem:[%s2746_s2 + $0x88] sm:$0xff]  ;;  %p1919_p9 = pnand %p1918_p8, %p2058_p5  ;;  %p1926_p13 = por %p1925_p12, %p1924_p11 }
  0x72   : > { %1639 = vmatmul.mubr.msk.f32.gmra.mxu0 %vm690_vm1, %v667_v42  ;;  %1655 = vmatmul.mubr.msk.f32.gmra.mxu1 %vm690_vm1, %v667_v42  ;;  %v1176_v42 = vld [vmem:[%s2746_s2 + $0x198] sm:$0xff]  ;;  %v1174_v50 = vld [vmem:[%s2746_s2 + $0x188] sm:$0xff] }
  0x73   : > { %815 = vmatprep.mubr.f32.mxu0 %v1986_v0  ;;  %976 = vmatprep.mubr.f32.mxu1 %v1986_v0  ;;  %p1920_p10 = pneg %p1919_p9 }
  0x74   : > { %1679 = vmatpush3.msra.mxu0 %v1139_v51  ;;  %1759 = vmatpush3.msra.mxu1 %v1171_v52  ;;  %v1126_v51 = vld [vmem:[%s2746_s2 + $0x8] sm:$0xff] }
  0x75   : > { %1680 = vmatprep.subr.mxu0 %v1154_v54  ;;  %1760 = vmatprep.subr.mxu1 %v1186_v55  ;;  %v1158_v52 = vld [vmem:[%s2746_s2 + $0x108] sm:$0xff]  ;;  %v1173_v54 = vld [vmem:[%s2746_s2 + $0x180] sm:$0xff]  ;;  %p1927_p0 = pnand %p1926_p13, %p1920_p10 }
  0x76   : > { %1640 = vmatmul.mubr.msk.f32.gmra.mxu0 %vm690_vm1, %v668_v43  ;;  %1656 = vmatmul.mubr.msk.f32.gmra.mxu1 %vm690_vm1, %v668_v43  ;;  %v1128_v43 = vld [vmem:[%s2746_s2 + $0x18] sm:$0xff]  ;;  %v1125_v55 = vld [vmem:[%s2746_s2] sm:$0xff] }
  0x77   : > { %821 = vmatprep.mubr.f32.mxu0 %v1986_v0  ;;  %982 = vmatprep.mubr.f32.mxu1 %v1986_v0 }
  0x78   : > { %1681 = vmatpush3.msra.mxu0 %v1138_v56  ;;  %1761 = vmatpush3.msra.mxu1 %v1170_v57  ;;  %v1157_v56 = vld [vmem:[%s2746_s2 + $0x100] sm:$0xff] }
  0x79   : > { %1682 = vmatprep.subr.mxu0 %v1153_v59  ;;  %1762 = vmatprep.subr.mxu1 %v1185_v60 }
  0x7a   : > { %1641 = vmatmul.mubr.msk.f32.gmra.mxu0 %vm690_vm1, %v669_v48  ;;  %1657 = vmatmul.mubr.msk.f32.gmra.mxu1 %vm690_vm1, %v669_v48  ;;  %v1127_v48 = vld [vmem:[%s2746_s2 + $0x10] sm:$0xff] }
  0x7b   : > { %827 = vmatprep.mubr.f32.mxu0 %v1986_v0  ;;  %988 = vmatprep.mubr.f32.mxu1 %v1986_v0 }
  0x7c   : > { %1683 = vmatpush3.msra.mxu0 %v1137_v61  ;;  %1763 = vmatpush3.msra.mxu1 %v1169_v62 }
  0x7d   : > { %1684 = vmatprep.subr.mxu0 %v1152_v1  ;;  %1764 = vmatprep.subr.mxu1 %v1184_v2 }
  0x7e   : > { %1642 = vmatmul.mubr.msk.f32.gmra.mxu0 %vm690_vm1, %v670_v53  ;;  %1658 = vmatmul.mubr.msk.f32.gmra.mxu1 %vm690_vm1, %v670_v53  ;;  %v1141_v53 = vld [vmem:[%s2746_s2 + $0x80] sm:$0xff] }
  0x7f   : > { %833 = vmatprep.mubr.f32.mxu0 %v1986_v0  ;;  %994 = vmatprep.mubr.f32.mxu1 %v1986_v0 }
  0x80   : > { %1685 = vmatpush3.msra.mxu0 %v1136_v3  ;;  %1765 = vmatpush3.msra.mxu1 %v1168_v4 }
  0x81   : > { %1686 = vmatprep.subr.mxu0 %v1151_v6  ;;  %1766 = vmatprep.subr.mxu1 %v1183_v7 }
  0x82   : > { %1643 = vmatmul.mubr.msk.f32.gmra.mxu0 %vm690_vm1, %v671_v58  ;;  %1659 = vmatmul.mubr.msk.f32.gmra.mxu1 %vm690_vm1, %v671_v58 }
  0x83   : > { %839 = vmatprep.mubr.f32.mxu0 %v1986_v0  ;;  %1000 = vmatprep.mubr.f32.mxu1 %v1986_v0 }
  0x84   : > { %1687 = vmatpush3.msra.mxu0 %v1135_v8  ;;  %1767 = vmatpush3.msra.mxu1 %v1167_v9 }
  0x85   : > { %1688 = vmatprep.subr.mxu0 %v1150_v11  ;;  %1768 = vmatprep.subr.mxu1 %v1182_v12 }
  0x86   : > { %1644 = vmatmul.mubr.msk.f32.gmra.mxu0 %vm690_vm1, %v672_v63  ;;  %1660 = vmatmul.mubr.msk.f32.gmra.mxu1 %vm690_vm1, %v672_v63 }
  0x87   : > { %845 = vmatprep.mubr.f32.mxu0 %v1986_v0  ;;  %1006 = vmatprep.mubr.f32.mxu1 %v1986_v0 }
  0x88   : > { %1689 = vmatpush3.msra.mxu0 %v1134_v13  ;;  %1769 = vmatpush3.msra.mxu1 %v1166_v14 }
  0x89   : > { %1690 = vmatprep.subr.mxu0 %v1149_v16  ;;  %1770 = vmatprep.subr.mxu1 %v1181_v17 }
  0x8a   : > { %1645 = vmatmul.mubr.msk.f32.gmra.mxu0 %vm690_vm1, %v673_v5  ;;  %1661 = vmatmul.mubr.msk.f32.gmra.mxu1 %vm690_vm1, %v673_v5 }
  0x8b   : > { %851 = vmatprep.mubr.f32.mxu0 %v1986_v0  ;;  %1012 = vmatprep.mubr.f32.mxu1 %v1986_v0 }
  0x8c   : > { %1691 = vmatpush3.msra.mxu0 %v1133_v18  ;;  %1771 = vmatpush3.msra.mxu1 %v1165_v19 }
  0x8d   : > { %1692 = vmatprep.subr.mxu0 %v1148_v21  ;;  %1772 = vmatprep.subr.mxu1 %v1180_v22 }
  0x8e   : > { %1646 = vmatmul.mubr.msk.f32.gmra.mxu0 %vm690_vm1, %v674_v10  ;;  %1662 = vmatmul.mubr.msk.f32.gmra.mxu1 %vm690_vm1, %v674_v10 }
  0x8f   : > { %857 = vmatprep.mubr.f32.mxu0 %v1986_v0  ;;  %1018 = vmatprep.mubr.f32.mxu1 %v1986_v0 }
  0x90   : > { %1693 = vmatpush3.msra.mxu0 %v1132_v23  ;;  %1773 = vmatpush3.msra.mxu1 %v1164_v24 }
  0x91   : > { %1694 = vmatprep.subr.mxu0 %v1147_v26  ;;  %1774 = vmatprep.subr.mxu1 %v1179_v27 }
  0x92   : > { %1647 = vmatmul.mubr.msk.f32.gmra.mxu0 %vm690_vm1, %v675_v15  ;;  %1663 = vmatmul.mubr.msk.f32.gmra.mxu1 %vm690_vm1, %v675_v15 }
  0x93   : > { %863 = vmatprep.mubr.f32.mxu0 %v1986_v0  ;;  %1024 = vmatprep.mubr.f32.mxu1 %v1986_v0 }
  0x94   : > { %1695 = vmatpush3.msra.mxu0 %v1131_v28  ;;  %1775 = vmatpush3.msra.mxu1 %v1163_v29 }
  0x95   : > { %1696 = vmatprep.subr.mxu0 %v1146_v31  ;;  %1776 = vmatprep.subr.mxu1 %v1178_v32 }
  0x96   : > { %1648 = vmatmul.mubr.msk.f32.gmra.mxu0 %vm690_vm1, %v676_v20  ;;  %1664 = vmatmul.mubr.msk.f32.gmra.mxu1 %vm690_vm1, %v676_v20 }
  0x97   : > { %869 = vmatprep.mubr.f32.mxu0 %v1986_v0  ;;  %1030 = vmatprep.mubr.f32.mxu1 %v1986_v0 }
  0x98   : > { %1697 = vmatpush3.msra.mxu0 %v1130_v33  ;;  %1777 = vmatpush3.msra.mxu1 %v1162_v34 }
  0x99   : > { %1698 = vmatprep.subr.mxu0 %v1145_v36  ;;  %1778 = vmatprep.subr.mxu1 %v1177_v37 }
  0x9a   : > { %1649 = vmatmul.mubr.msk.f32.gmra.mxu0 %vm690_vm1, %v677_v25  ;;  %1665 = vmatmul.mubr.msk.f32.gmra.mxu1 %vm690_vm1, %v677_v25 }
  0x9b   : > { %875 = vmatprep.mubr.f32.mxu0 %v1986_v0  ;;  %1036 = vmatprep.mubr.f32.mxu1 %v1986_v0 }
  0x9c   : > { %1699 = vmatpush3.msra.mxu0 %v1129_v38  ;;  %1779 = vmatpush3.msra.mxu1 %v1161_v39 }
  0x9d   : > { %1700 = vmatprep.subr.mxu0 %v1144_v41  ;;  %1780 = vmatprep.subr.mxu1 %v1176_v42 }
  0x9e   : > { %1650 = vmatmul.mubr.msk.f32.gmra.mxu0 %vm690_vm1, %v678_v30  ;;  %1666 = vmatmul.mubr.msk.f32.gmra.mxu1 %vm690_vm1, %v678_v30 }
  0x9f   : > { %881 = vmatprep.mubr.f32.mxu0 %v1986_v0  ;;  %1042 = vmatprep.mubr.f32.mxu1 %v1986_v0 }
  0xa0   : > { %1701 = vmatpush3.msra.mxu0 %v1128_v43  ;;  %1781 = vmatpush3.msra.mxu1 %v1160_v44 }
  0xa1   : > { %1702 = vmatprep.subr.mxu0 %v1143_v46  ;;  %1782 = vmatprep.subr.mxu1 %v1175_v47 }
  0xa2   : > { %1651 = vmatmul.mubr.msk.f32.gmra.mxu0 %vm690_vm1, %v679_v35  ;;  %1667 = vmatmul.mubr.msk.f32.gmra.mxu1 %vm690_vm1, %v679_v35 }
  0xa3   : > { %887 = vmatprep.mubr.f32.mxu0 %v1986_v0  ;;  %1048 = vmatprep.mubr.f32.mxu1 %v1986_v0 }
  0xa4   : > { %1703 = vmatpush3.msra.mxu0 %v1127_v48 }
  0xa5   : > { %1704 = vmatprep.subr.mxu0 %v1142_v49 }
  0xa6   : > { %1652 = vmatmul.mubr.msk.f32.gmra.mxu0 %vm690_vm1, %v680_v40  ;;  %1668 = vmatmul.mubr.msk.f32.gmra.mxu1 %vm690_vm1, %v680_v40 }
  0xa7   : > { %893 = vmatprep.mubr.f32.mxu0 %v1986_v0  ;;  %1054 = vmatprep.mubr.f32.mxu1 %v1986_v0  ;;  %v1159_v0 = vld [vmem:[%s2746_s2 + $0x110] sm:$0xff] }
  0xa8   : > { %1783 = vmatpush3.msra.mxu1 %v1159_v0  ;;  %1705 = vmatpush3.msra.mxu0 %v1126_v51 }
  0xa9   : > { %1784 = vmatprep.subr.mxu1 %v1174_v50  ;;  %1706 = vmatprep.subr.mxu0 %v1141_v53 }
  0xaa   : > { %1653 = vmatmul.mubr.msk.f32.gmra.mxu0 %vm690_vm1, %v681_v45  ;;  %1669 = vmatmul.mubr.msk.f32.gmra.mxu1 %vm690_vm1, %v681_v45 }
  0xab   : > { %1785 = vmatpush3.msra.mxu1 %v1158_v52  ;;  %1707 = vmatpush3.msra.mxu0 %v1125_v55 }
  0xac   : > { %1786 = vmatprep.subr.mxu1 %v1173_v54 }
  0xad   : > { %1787 = vmatpush3.msra.mxu1 %v1157_v56 }
  0xee   : > { %v2480_v57 = vpop.f32.mrf.mxu0  ;;  %v2482_v58 = vpop.f32.mrf.mxu1 }
  0xf0   : > { %v2484_v59 = vpop.f32.mrf.mxu0  ;;  %v2486_v60 = vpop.f32.mrf.mxu1 }
  0xf2   : > { %v2488_v61 = vpop.f32.mrf.mxu0  ;;  %v2490_v62 = vpop.f32.mrf.mxu1 }
  0xf4   : > { %v2492_v63 = vpop.f32.mrf.mxu0  ;;  %v2494_v1 = vpop.f32.mrf.mxu1 }
  0xf6   : > { %v2496_v2 = vpop.f32.mrf.mxu0  ;;  %v2498_v3 = vpop.f32.mrf.mxu1 }
  0xf8   : > { %v2500_v4 = vpop.f32.mrf.mxu0  ;;  %v2502_v5 = vpop.f32.mrf.mxu1 }
  0xfa   : > { %v2504_v6 = vpop.f32.mrf.mxu0  ;;  %v2506_v7 = vpop.f32.mrf.mxu1 }
  0xfc   : > { %v2508_v8 = vpop.f32.mrf.mxu0  ;;  %v2510_v9 = vpop.f32.mrf.mxu1 }
  0xfe   : > { %v2512_v10 = vpop.f32.mrf.mxu0  ;;  %v2514_v11 = vpop.f32.mrf.mxu1 }
 0x100   : > { %v2516_v12 = vpop.f32.mrf.mxu0  ;;  %v2518_v13 = vpop.f32.mrf.mxu1 }
 0x102   : > { %v2520_v14 = vpop.f32.mrf.mxu0  ;;  %v2522_v15 = vpop.f32.mrf.mxu1 }
 0x104   : > { %v2524_v16 = vpop.f32.mrf.mxu0  ;;  %v2526_v17 = vpop.f32.mrf.mxu1 }
 0x106   : > { %v2528_v18 = vpop.f32.mrf.mxu0  ;;  %v2530_v19 = vpop.f32.mrf.mxu1 }
 0x108   : > { %v2532_v20 = vpop.f32.mrf.mxu0  ;;  %v2534_v21 = vpop.f32.mrf.mxu1 }
 0x10a   : > { %v2536_v22 = vpop.f32.mrf.mxu0  ;;  %v2538_v23 = vpop.f32.mrf.mxu1 }
 0x10c   : > { %v2540_v24 = vpop.f32.mrf.mxu0  ;;  %v2542_v25 = vpop.f32.mrf.mxu1 }
 0x10e   : > { %v2544_v26 = vpop.f32.mrf.mxu0  ;;  %v2546_v27 = vpop.f32.mrf.mxu1 }
 0x110   : > { %v2548_v28 = vpop.f32.mrf.mxu0  ;;  %v2550_v29 = vpop.f32.mrf.mxu1 }
 0x112   : > { %v2552_v30 = vpop.f32.mrf.mxu0  ;;  %v2554_v31 = vpop.f32.mrf.mxu1 }
 0x114   : > { %v2556_v32 = vpop.f32.mrf.mxu0  ;;  %v2558_v33 = vpop.f32.mrf.mxu1 }
 0x116   : > { %v2560_v34 = vpop.f32.mrf.mxu0  ;;  %v2562_v35 = vpop.f32.mrf.mxu1 }
 0x118   : > { %v2564_v36 = vpop.f32.mrf.mxu0  ;;  %v2566_v37 = vpop.f32.mrf.mxu1 }
 0x11a   : > { %v2568_v38 = vpop.f32.mrf.mxu0  ;;  %v2570_v39 = vpop.f32.mrf.mxu1 }
 0x11c   : > { %v2572_v40 = vpop.f32.mrf.mxu0  ;;  %v2574_v41 = vpop.f32.mrf.mxu1 }
 0x11e   : > { %v2576_v42 = vpop.f32.mrf.mxu0  ;;  %v2578_v43 = vpop.f32.mrf.mxu1 }
 0x11f   : > { %2753 = vst [vmem:[#allocation8_spill] sm:$0xff] %v2576_v42  ;;  %2754 = vst [vmem:[#allocation9_spill] sm:$0xff] %v2578_v43 }
 0x120   : > { %v2580_v44 = vpop.f32.mrf.mxu0  ;;  %v2582_v45 = vpop.f32.mrf.mxu1 }
 0x122   : > { %v2584_v46 = vpop.f32.mrf.mxu0  ;;  %v2586_v47 = vpop.f32.mrf.mxu1 }
 0x123   : > { %2755 = vst [vmem:[#allocation10_spill] sm:$0xff] %v2584_v46  ;;  %2756 = vst [vmem:[#allocation11_spill] sm:$0xff] %v2586_v47 }
 0x124   : > { %v2588_v48 = vpop.f32.mrf.mxu0  ;;  %v2590_v0 = vpop.f32.mrf.mxu1 }
 0x125   : > { %2757 = vst [vmem:[#allocation12_spill] sm:$0xff] %v2588_v48  ;;  %2758 = vst [vmem:[#allocation13_spill] sm:$0xff] %v2590_v0 }
 0x126   : > { %v2592_v49 = vpop.f32.mrf.mxu0  ;;  %v2594_v50 = vpop.f32.mrf.mxu1 }
 0x127   : > { %2759 = vst [vmem:[#allocation14_spill] sm:$0xff] %v2592_v49  ;;  %2760 = vst [vmem:[#allocation15_spill] sm:$0xff] %v2594_v50 }
 0x128   : > { %v2596_v51 = vpop.f32.mrf.mxu0  ;;  %v2598_v52 = vpop.f32.mrf.mxu1 }
 0x129   : > { %2761 = vst [vmem:[#allocation16_spill] sm:$0xff] %v2596_v51  ;;  %2762 = vst [vmem:[#allocation17_spill] sm:$0xff] %v2598_v52 }
 0x12a   : > { %v2600_v53 = vpop.f32.mrf.mxu0  ;;  %v2602_v54 = vpop.f32.mrf.mxu1 }
 0x12b   : > { %2763 = vst [vmem:[#allocation18_spill] sm:$0xff] %v2600_v53  ;;  %2764 = vst [vmem:[#allocation19_spill] sm:$0xff] %v2602_v54 }
 0x12c   : > { %v2604_v55 = vpop.f32.mrf.mxu0  ;;  %v2606_v56 = vpop.f32.mrf.mxu1 }
 0x12d   : > { %2765 = vst [vmem:[#allocation20_spill] sm:$0xff] %v2604_v55  ;;  %2766 = vst [vmem:[#allocation21_spill] sm:$0xff] %v2606_v56 }
 0x12e   : > { %v805_v47 = vpop.f32.mrf.mxu0  ;;  %v966_v46 = vpop.f32.mrf.mxu1 }
 0x12f   : > { %v1061_v51 = vmul.f32 %v805_v47, %v2480_v57  ;;  %v1063_v52 = vmul.f32 %v966_v46, %v2482_v58 }
 0x130   : > { %v807_v48 = vpop.f32.mrf.mxu0  ;;  %v968_v0 = vpop.f32.mrf.mxu1 }
 0x131   : > { %v1062_v49 = vmul.f32 %v807_v48, %v2484_v59  ;;  %v1064_v50 = vmul.f32 %v968_v0, %v2486_v60 }
 0x132   : > { %v811_v43 = vpop.f32.mrf.mxu0  ;;  %v972_v53 = vpop.f32.mrf.mxu1 }
 0x133   : > { %1253 = vmatprep.mubr.f32.mxu0 %v1062_v49  ;;  %1398 = vmatprep.mubr.f32.mxu1 %v1064_v50  ;;  %v1065_v59 = vmul.f32 %v811_v43, %v2488_v61  ;;  %v1067_v60 = vmul.f32 %v972_v53, %v2490_v62 }
 0x134   : > { %v813_v54 = vpop.f32.mrf.mxu0  ;;  %v974_v55 = vpop.f32.mrf.mxu1  ;;  %1254 = vmatmul.mubr.f32.vlgmr.msra.gmra.mxu0 %v1061_v51  ;;  %1399 = vmatmul.mubr.f32.vlgmr.msra.gmra.mxu1 %v1063_v52 }
 0x135   : > { %v1066_v56 = vmul.f32 %v813_v54, %v2492_v63  ;;  %v1068_v42 = vmul.f32 %v974_v55, %v2494_v1 }
 0x136   : > { %v817_v48 = vpop.f32.mrf.mxu0  ;;  %v978_v57 = vpop.f32.mrf.mxu1 }
 0x137   : > { %1258 = vmatprep.mubr.f32.mxu0 %v1066_v56  ;;  %1403 = vmatprep.mubr.f32.mxu1 %v1068_v42  ;;  %v1069_v63 = vmul.f32 %v817_v48, %v2496_v2  ;;  %v1071_v1 = vmul.f32 %v978_v57, %v2498_v3 }
 0x138   : > { %v819_v58 = vpop.f32.mrf.mxu0  ;;  %v980_v46 = vpop.f32.mrf.mxu1  ;;  %1259 = vmatmul.mubr.f32.gmra.mxu0 %v1065_v59  ;;  %1404 = vmatmul.mubr.f32.gmra.mxu1 %v1067_v60 }
 0x139   : > { %v1070_v47 = vmul.f32 %v819_v58, %v2500_v4  ;;  %v1072_v0 = vmul.f32 %v980_v46, %v2502_v5 }
 0x13a   : > { %v823_v49 = vpop.f32.mrf.mxu0  ;;  %v984_v61 = vpop.f32.mrf.mxu1 }
 0x13b   : > { %1263 = vmatprep.mubr.f32.mxu0 %v1070_v47  ;;  %1408 = vmatprep.mubr.f32.mxu1 %v1072_v0  ;;  %v1073_v4 = vmul.f32 %v823_v49, %v2504_v6  ;;  %v1075_v5 = vmul.f32 %v984_v61, %v2506_v7 }
 0x13c   : > { %v825_v62 = vpop.f32.mrf.mxu0  ;;  %v986_v43 = vpop.f32.mrf.mxu1  ;;  %1264 = vmatmul.mubr.f32.gmra.mxu0 %v1069_v63  ;;  %1409 = vmatmul.mubr.f32.gmra.mxu1 %v1071_v1 }
 0x13d   : > { %v1074_v42 = vmul.f32 %v825_v62, %v2508_v8  ;;  %v1076_v50 = vmul.f32 %v986_v43, %v2510_v9 }
 0x13e   : > { %v829_v51 = vpop.f32.mrf.mxu0  ;;  %v990_v2 = vpop.f32.mrf.mxu1 }
 0x13f   : > { %1268 = vmatprep.mubr.f32.mxu0 %v1074_v42  ;;  %1413 = vmatprep.mubr.f32.mxu1 %v1076_v50  ;;  %v1077_v8 = vmul.f32 %v829_v51, %v2512_v10  ;;  %v1079_v9 = vmul.f32 %v990_v2, %v2514_v11 }
 0x140   : > { %v831_v3 = vpop.f32.mrf.mxu0  ;;  %v992_v52 = vpop.f32.mrf.mxu1  ;;  %1269 = vmatmul.mubr.f32.gmra.mxu0 %v1073_v4  ;;  %1414 = vmatmul.mubr.f32.gmra.mxu1 %v1075_v5 }
 0x141   : > { %v1078_v53 = vmul.f32 %v831_v3, %v2516_v12  ;;  %v1080_v54 = vmul.f32 %v992_v52, %v2518_v13 }
 0x142   : > { %v835_v55 = vpop.f32.mrf.mxu0  ;;  %v996_v6 = vpop.f32.mrf.mxu1 }
 0x143   : > { %1273 = vmatprep.mubr.f32.mxu0 %v1078_v53  ;;  %1418 = vmatprep.mubr.f32.mxu1 %v1080_v54  ;;  %v1081_v12 = vmul.f32 %v835_v55, %v2520_v14  ;;  %v1083_v13 = vmul.f32 %v996_v6, %v2522_v15 }
 0x144   : > { %v837_v7 = vpop.f32.mrf.mxu0  ;;  %v998_v56 = vpop.f32.mrf.mxu1  ;;  %1274 = vmatmul.mubr.f32.gmra.mxu0 %v1077_v8  ;;  %1419 = vmatmul.mubr.f32.gmra.mxu1 %v1079_v9 }
 0x145   : > { %v1082_v59 = vmul.f32 %v837_v7, %v2524_v16  ;;  %v1084_v60 = vmul.f32 %v998_v56, %v2526_v17 }
 0x146   : > { %v841_v48 = vpop.f32.mrf.mxu0  ;;  %v1002_v10 = vpop.f32.mrf.mxu1 }
 0x147   : > { %1278 = vmatprep.mubr.f32.mxu0 %v1082_v59  ;;  %1423 = vmatprep.mubr.f32.mxu1 %v1084_v60  ;;  %v1085_v16 = vmul.f32 %v841_v48, %v2528_v18  ;;  %v1087_v17 = vmul.f32 %v1002_v10, %v2530_v19  ;;  %v2767_v59 = vld [vmem:[#allocation8_spill] sm:$0xff]  ;;  %v2768_v60 = vld [vmem:[#allocation9_spill] sm:$0xff] }
 0x148   : > { %v843_v11 = vpop.f32.mrf.mxu0  ;;  %v1004_v57 = vpop.f32.mrf.mxu1  ;;  %1279 = vmatmul.mubr.f32.gmra.mxu0 %v1081_v12  ;;  %1424 = vmatmul.mubr.f32.gmra.mxu1 %v1083_v13  ;;  %v2769_v48 = vld [vmem:[#allocation12_spill] sm:$0xff] }
 0x149   : > { %v1086_v58 = vmul.f32 %v843_v11, %v2532_v20  ;;  %v1088_v46 = vmul.f32 %v1004_v57, %v2534_v21  ;;  %v2770_v11 = vld [vmem:[#allocation13_spill] sm:$0xff] }
 0x14a   : > { %v847_v47 = vpop.f32.mrf.mxu0  ;;  %v1008_v14 = vpop.f32.mrf.mxu1 }
 0x14b   : > { %1283 = vmatprep.mubr.f32.mxu0 %v1086_v58  ;;  %1428 = vmatprep.mubr.f32.mxu1 %v1088_v46  ;;  %v1089_v20 = vmul.f32 %v847_v47, %v2536_v22  ;;  %v1091_v21 = vmul.f32 %v1008_v14, %v2538_v23  ;;  %v2771_v58 = vld [vmem:[#allocation10_spill] sm:$0xff]  ;;  %v2772_v46 = vld [vmem:[#allocation11_spill] sm:$0xff] }
 0x14c   : > { %v849_v15 = vpop.f32.mrf.mxu0  ;;  %v1010_v0 = vpop.f32.mrf.mxu1  ;;  %1284 = vmatmul.mubr.f32.gmra.mxu0 %v1085_v16  ;;  %1429 = vmatmul.mubr.f32.gmra.mxu1 %v1087_v17 }
 0x14d   : > { %v1090_v63 = vmul.f32 %v849_v15, %v2540_v24  ;;  %v1092_v1 = vmul.f32 %v1010_v0, %v2542_v25  ;;  %v2773_v15 = vld [vmem:[#allocation16_spill] sm:$0xff] }
 0x14e   : > { %v853_v49 = vpop.f32.mrf.mxu0  ;;  %v1014_v18 = vpop.f32.mrf.mxu1 }
 0x14f   : > { %1288 = vmatprep.mubr.f32.mxu0 %v1090_v63  ;;  %1433 = vmatprep.mubr.f32.mxu1 %v1092_v1  ;;  %v1093_v24 = vmul.f32 %v853_v49, %v2544_v26  ;;  %v1095_v25 = vmul.f32 %v1014_v18, %v2546_v27  ;;  %v2774_v63 = vld [vmem:[#allocation17_spill] sm:$0xff]  ;;  %v2776_v49 = vld [vmem:[#allocation15_spill] sm:$0xff] }
 0x150   : > { %v855_v19 = vpop.f32.mrf.mxu0  ;;  %v1016_v61 = vpop.f32.mrf.mxu1  ;;  %1289 = vmatmul.mubr.f32.gmra.mxu0 %v1089_v20  ;;  %1434 = vmatmul.mubr.f32.gmra.mxu1 %v1091_v21  ;;  %v2775_v20 = vld [vmem:[#allocation14_spill] sm:$0xff] }
 0x151   : > { %v1094_v62 = vmul.f32 %v855_v19, %v2548_v28  ;;  %v1096_v43 = vmul.f32 %v1016_v61, %v2550_v29 }
 0x152   : > { %v859_v42 = vpop.f32.mrf.mxu0  ;;  %v1020_v22 = vpop.f32.mrf.mxu1 }
 0x153   : > { %1293 = vmatprep.mubr.f32.mxu0 %v1094_v62  ;;  %1438 = vmatprep.mubr.f32.mxu1 %v1096_v43  ;;  %v1097_v28 = vmul.f32 %v859_v42, %v2552_v30  ;;  %v1099_v29 = vmul.f32 %v1020_v22, %v2554_v31  ;;  %v2778_v42 = vld [vmem:[#allocation21_spill] sm:$0xff] }
 0x154   : > { %v861_v23 = vpop.f32.mrf.mxu0  ;;  %v1022_v50 = vpop.f32.mrf.mxu1  ;;  %1294 = vmatmul.mubr.f32.gmra.mxu0 %v1093_v24  ;;  %1439 = vmatmul.mubr.f32.gmra.mxu1 %v1095_v25  ;;  %v2777_v24 = vld [vmem:[#allocation20_spill] sm:$0xff] }
 0x155   : > { %v1098_v4 = vmul.f32 %v861_v23, %v2556_v32  ;;  %v1100_v5 = vmul.f32 %v1022_v50, %v2558_v33  ;;  %v2779_v23 = vld [vmem:[#allocation18_spill] sm:$0xff] }
 0x156   : > { %v865_v51 = vpop.f32.mrf.mxu0  ;;  %v1026_v26 = vpop.f32.mrf.mxu1 }
 0x157   : > { %1298 = vmatprep.mubr.f32.mxu0 %v1098_v4  ;;  %1443 = vmatprep.mubr.f32.mxu1 %v1100_v5  ;;  %v1101_v32 = vmul.f32 %v865_v51, %v2560_v34  ;;  %v1103_v33 = vmul.f32 %v1026_v26, %v2562_v35  ;;  %v2780_v4 = vld [vmem:[#allocation19_spill] sm:$0xff] }
 0x158   : > { %v867_v27 = vpop.f32.mrf.mxu0  ;;  %v1028_v2 = vpop.f32.mrf.mxu1  ;;  %1299 = vmatmul.mubr.f32.gmra.mxu0 %v1097_v28  ;;  %1444 = vmatmul.mubr.f32.gmra.mxu1 %v1099_v29 }
 0x159   : > { %v1102_v3 = vmul.f32 %v867_v27, %v2564_v36  ;;  %v1104_v52 = vmul.f32 %v1028_v2, %v2566_v37 }
 0x15a   : > { %v871_v53 = vpop.f32.mrf.mxu0  ;;  %v1032_v30 = vpop.f32.mrf.mxu1 }
 0x15b   : > { %1303 = vmatprep.mubr.f32.mxu0 %v1102_v3  ;;  %1448 = vmatprep.mubr.f32.mxu1 %v1104_v52  ;;  %v1105_v36 = vmul.f32 %v871_v53, %v2568_v38  ;;  %v1107_v37 = vmul.f32 %v1032_v30, %v2570_v39 }
 0x15c   : > { %v873_v31 = vpop.f32.mrf.mxu0  ;;  %v1034_v54 = vpop.f32.mrf.mxu1  ;;  %1304 = vmatmul.mubr.f32.gmra.mxu0 %v1101_v32  ;;  %1449 = vmatmul.mubr.f32.gmra.mxu1 %v1103_v33 }
 0x15d   : > { %v1106_v8 = vmul.f32 %v873_v31, %v2572_v40  ;;  %v1108_v9 = vmul.f32 %v1034_v54, %v2574_v41 }
 0x15e   : > { %v877_v55 = vpop.f32.mrf.mxu0  ;;  %v1038_v34 = vpop.f32.mrf.mxu1 }
 0x15f   : > { %1308 = vmatprep.mubr.f32.mxu0 %v1106_v8  ;;  %1453 = vmatprep.mubr.f32.mxu1 %v1108_v9  ;;  %v1109_v40 = vmul.f32 %v877_v55, %v2767_v59  ;;  %v1111_v41 = vmul.f32 %v1038_v34, %v2768_v60 }
 0x160   : > { %v879_v35 = vpop.f32.mrf.mxu0  ;;  %v1040_v6 = vpop.f32.mrf.mxu1  ;;  %1309 = vmatmul.mubr.f32.gmra.mxu0 %v1105_v36  ;;  %1454 = vmatmul.mubr.f32.gmra.mxu1 %v1107_v37 }
 0x161   : > { %v1110_v7 = vmul.f32 %v879_v35, %v2580_v44  ;;  %v1112_v56 = vmul.f32 %v1040_v6, %v2582_v45 }
 0x162   : > { %v883_v12 = vpop.f32.mrf.mxu0  ;;  %v1044_v38 = vpop.f32.mrf.mxu1 }
 0x163   : > { %1313 = vmatprep.mubr.f32.mxu0 %v1110_v7  ;;  %1458 = vmatprep.mubr.f32.mxu1 %v1112_v56  ;;  %v1113_v44 = vmul.f32 %v883_v12, %v2771_v58  ;;  %v1115_v45 = vmul.f32 %v1044_v38, %v2772_v46 }
 0x164   : > { %v885_v39 = vpop.f32.mrf.mxu0  ;;  %v1046_v13 = vpop.f32.mrf.mxu1  ;;  %1314 = vmatmul.mubr.f32.gmra.mxu0 %v1109_v40  ;;  %1459 = vmatmul.mubr.f32.gmra.mxu1 %v1111_v41 }
 0x165   : > { %v1114_v10 = vmul.f32 %v885_v39, %v2769_v48  ;;  %v1116_v57 = vmul.f32 %v1046_v13, %v2770_v11 }
 0x166   : > { %v889_v16 = vpop.f32.mrf.mxu0  ;;  %v1050_v17 = vpop.f32.mrf.mxu1 }
 0x167   : > { %1318 = vmatprep.mubr.f32.mxu0 %v1114_v10  ;;  %1463 = vmatprep.mubr.f32.mxu1 %v1116_v57  ;;  %v1117_v21 = vmul.f32 %v889_v16, %v2775_v20  ;;  %v1119_v18 = vmul.f32 %v1050_v17, %v2776_v49 }
 0x168   : > { %v891_v47 = vpop.f32.mrf.mxu0  ;;  %v1052_v14 = vpop.f32.mrf.mxu1  ;;  %1319 = vmatmul.mubr.f32.gmra.mxu0 %v1113_v44  ;;  %1464 = vmatmul.mubr.f32.gmra.mxu1 %v1115_v45 }
 0x169   : > { %v1118_v0 = vmul.f32 %v891_v47, %v2773_v15  ;;  %v1120_v1 = vmul.f32 %v1052_v14, %v2774_v63 }
 0x16a   : > { %v895_v19 = vpop.f32.mrf.mxu0  ;;  %v1056_v61 = vpop.f32.mrf.mxu1 }
 0x16b   : > { %1323 = vmatprep.mubr.f32.mxu0 %v1118_v0  ;;  %1468 = vmatprep.mubr.f32.mxu1 %v1120_v1  ;;  %v1121_v50 = vmul.f32 %v895_v19, %v2779_v23  ;;  %v1123_v5 = vmul.f32 %v1056_v61, %v2780_v4 }
 0x16c   : > { %v897_v62 = vpop.f32.mrf.mxu0  ;;  %v1058_v43 = vpop.f32.mrf.mxu1  ;;  %1324 = vmatmul.mubr.f32.gmra.mxu0 %v1117_v21  ;;  %1469 = vmatmul.mubr.f32.gmra.mxu1 %v1119_v18 }
 0x16d   : > { %v1122_v25 = vmul.f32 %v897_v62, %v2777_v24  ;;  %v1124_v22 = vmul.f32 %v1058_v43, %v2778_v42 }
 0x16f   : > { %1328 = vmatprep.mubr.f32.mxu0 %v1122_v25  ;;  %1473 = vmatprep.mubr.f32.mxu1 %v1124_v22 }
 0x170   : > { %1329 = vmatmul.mubr.f32.gmra.mxu0 %v1121_v50  ;;  %1474 = vmatmul.mubr.f32.gmra.mxu1 %v1123_v5 }
 0x1f4   : > { %v1708_v28 = vpop.f32.mrf.mxu0  ;;  %v1788_v29 = vpop.f32.mrf.mxu1 }
 0x1f6   : > { %v1709_v51 = vpop.f32.mrf.mxu0  ;;  %v1789_v26 = vpop.f32.mrf.mxu1 }
 0x1f7   : > { %v1710_v27 = vadd.f32 %v1709_v51, %v1708_v28  ;;  %v1790_v2 = vadd.f32 %v1789_v26, %v1788_v29 }
 0x1f8   : > { %v1711_v3 = vpop.f32.mrf.mxu0  ;;  %v1791_v52 = vpop.f32.mrf.mxu1 }
 0x1f9   : > { %v1401_v32 = vadd.f32 %v1790_v2, %v1710_v27 }
 0x1fa   : > { %v1712_v33 = vpop.f32.mrf.mxu0  ;;  %v1792_v53 = vpop.f32.mrf.mxu1 }
 0x1fb   : > { %1479 = vst [vmem:[%s2675_s15] sm:$0xff] %v1401_v32  ;;  %v1713_v30 = vadd.f32 %v1712_v33, %v1711_v3  ;;  %v1793_v31 = vadd.f32 %v1792_v53, %v1791_v52 }
 0x1fc   : > { %v1714_v54 = vpop.f32.mrf.mxu0  ;;  %v1794_v8 = vpop.f32.mrf.mxu1 }
 0x1fd   : > { %v1406_v9 = vadd.f32 %v1793_v31, %v1713_v30 }
 0x1fe   : > { %v1715_v36 = vpop.f32.mrf.mxu0  ;;  %v1795_v37 = vpop.f32.mrf.mxu1 }
 0x1ff   : > { %1480 = vst [vmem:[%s2675_s15 + $0x8] sm:$0xff] %v1406_v9  ;;  %v1716_v55 = vadd.f32 %v1715_v36, %v1714_v54  ;;  %v1796_v34 = vadd.f32 %v1795_v37, %v1794_v8 }
 0x200   : > { %v1717_v35 = vpop.f32.mrf.mxu0  ;;  %v1797_v6 = vpop.f32.mrf.mxu1 }
 0x201   : > { %v1411_v7 = vadd.f32 %v1796_v34, %v1716_v55 }
 0x202   : > { %v1718_v56 = vpop.f32.mrf.mxu0  ;;  %v1798_v59 = vpop.f32.mrf.mxu1 }
 0x203   : > { %1481 = vst [vmem:[%s2675_s15 + $0x10] sm:$0xff] %v1411_v7  ;;  %v1719_v40 = vadd.f32 %v1718_v56, %v1717_v35  ;;  %v1799_v60 = vadd.f32 %v1798_v59, %v1797_v6 }
 0x204   : > { %v1720_v41 = vpop.f32.mrf.mxu0  ;;  %v1800_v12 = vpop.f32.mrf.mxu1 }
 0x205   : > { %v1416_v38 = vadd.f32 %v1799_v60, %v1719_v40 }
 0x206   : > { %v1721_v39 = vpop.f32.mrf.mxu0  ;;  %v1801_v13 = vpop.f32.mrf.mxu1 }
 0x207   : > { %1482 = vst [vmem:[%s2675_s15 + $0x18] sm:$0xff] %v1416_v38  ;;  %v1722_v48 = vadd.f32 %v1721_v39, %v1720_v41  ;;  %v1802_v10 = vadd.f32 %v1801_v13, %v1800_v12 }
 0x208   : > { %v1723_v11 = vpop.f32.mrf.mxu0  ;;  %v1803_v57 = vpop.f32.mrf.mxu1 }
 0x209   : > { %v1421_v58 = vadd.f32 %v1802_v10, %v1722_v48 }
 0x20a   : > { %v1724_v44 = vpop.f32.mrf.mxu0  ;;  %v1804_v46 = vpop.f32.mrf.mxu1 }
 0x20b   : > { %1483 = vst [vmem:[%s2675_s15 + $0x20] sm:$0xff] %v1421_v58  ;;  %v1725_v45 = vadd.f32 %v1724_v44, %v1723_v11  ;;  %v1805_v16 = vadd.f32 %v1804_v46, %v1803_v57 }
 0x20c   : > { %v1726_v17 = vpop.f32.mrf.mxu0  ;;  %v1806_v47 = vpop.f32.mrf.mxu1 }
 0x20d   : > { %v1426_v14 = vadd.f32 %v1805_v16, %v1725_v45 }
 0x20e   : > { %v1727_v15 = vpop.f32.mrf.mxu0  ;;  %v1807_v0 = vpop.f32.mrf.mxu1 }
 0x20f   : > { %1484 = vst [vmem:[%s2675_s15 + $0x28] sm:$0xff] %v1426_v14  ;;  %v1728_v63 = vadd.f32 %v1727_v15, %v1726_v17  ;;  %v1808_v1 = vadd.f32 %v1807_v0, %v1806_v47 }
 0x210   : > { %v1729_v20 = vpop.f32.mrf.mxu0  ;;  %v1809_v21 = vpop.f32.mrf.mxu1 }
 0x211   : > { %v1431_v49 = vadd.f32 %v1808_v1, %v1728_v63 }
 0x212   : > { %v1730_v18 = vpop.f32.mrf.mxu0  ;;  %v1810_v19 = vpop.f32.mrf.mxu1 }
 0x213   : > { %1485 = vst [vmem:[%s2675_s15 + $0x30] sm:$0xff] %v1431_v49  ;;  %v1731_v61 = vadd.f32 %v1730_v18, %v1729_v20  ;;  %v1811_v62 = vadd.f32 %v1810_v19, %v1809_v21 }
 0x214   : > { %v1732_v43 = vpop.f32.mrf.mxu0  ;;  %v1812_v24 = vpop.f32.mrf.mxu1 }
 0x215   : > { %v1436_v25 = vadd.f32 %v1811_v62, %v1731_v61 }
 0x216   : > { %v1733_v42 = vpop.f32.mrf.mxu0  ;;  %v1813_v22 = vpop.f32.mrf.mxu1 }
 0x217   : > { %1486 = vst [vmem:[%s2675_s15 + $0x38] sm:$0xff] %v1436_v25  ;;  %v1734_v23 = vadd.f32 %v1733_v42, %v1732_v43  ;;  %v1814_v50 = vadd.f32 %v1813_v22, %v1812_v24 }
 0x218   : > { %v1735_v4 = vpop.f32.mrf.mxu0  ;;  %v1815_v5 = vpop.f32.mrf.mxu1 }
 0x219   : > { %v1441_v28 = vadd.f32 %v1814_v50, %v1734_v23 }
 0x21a   : > { %v1736_v29 = vpop.f32.mrf.mxu0  ;;  %v1816_v51 = vpop.f32.mrf.mxu1 }
 0x21b   : > { %1487 = vst [vmem:[%s2675_s15 + $0x40] sm:$0xff] %v1441_v28  ;;  %v1737_v26 = vadd.f32 %v1736_v29, %v1735_v4  ;;  %v1817_v27 = vadd.f32 %v1816_v51, %v1815_v5 }
 0x21c   : > { %v1738_v2 = vpop.f32.mrf.mxu0  ;;  %v1818_v3 = vpop.f32.mrf.mxu1 }
 0x21d   : > { %v1446_v52 = vadd.f32 %v1817_v27, %v1737_v26 }
 0x21e   : > { %v1739_v32 = vpop.f32.mrf.mxu0  ;;  %v1819_v33 = vpop.f32.mrf.mxu1 }
 0x21f   : > { %1488 = vst [vmem:[%s2675_s15 + $0x48] sm:$0xff] %v1446_v52  ;;  %v1740_v53 = vadd.f32 %v1739_v32, %v1738_v2  ;;  %v1820_v30 = vadd.f32 %v1819_v33, %v1818_v3 }
 0x220   : > { %v1741_v31 = vpop.f32.mrf.mxu0  ;;  %v1821_v54 = vpop.f32.mrf.mxu1 }
 0x221   : > { %v1451_v8 = vadd.f32 %v1820_v30, %v1740_v53 }
 0x222   : > { %v1742_v9 = vpop.f32.mrf.mxu0  ;;  %v1822_v36 = vpop.f32.mrf.mxu1 }
 0x223   : > { %1489 = vst [vmem:[%s2675_s15 + $0x50] sm:$0xff] %v1451_v8  ;;  %v1743_v37 = vadd.f32 %v1742_v9, %v1741_v31  ;;  %v1823_v55 = vadd.f32 %v1822_v36, %v1821_v54 }
 0x224   : > { %v1744_v34 = vpop.f32.mrf.mxu0  ;;  %v1824_v35 = vpop.f32.mrf.mxu1 }
 0x225   : > { %v1456_v6 = vadd.f32 %v1823_v55, %v1743_v37 }
 0x226   : > { %v1745_v7 = vpop.f32.mrf.mxu0  ;;  %v1825_v56 = vpop.f32.mrf.mxu1 }
 0x227   : > { %1490 = vst [vmem:[%s2675_s15 + $0x58] sm:$0xff] %v1456_v6  ;;  %v1746_v59 = vadd.f32 %v1745_v7, %v1744_v34  ;;  %v1826_v40 = vadd.f32 %v1825_v56, %v1824_v35 }
 0x228   : > { %v1747_v60 = vpop.f32.mrf.mxu0  ;;  %v1827_v41 = vpop.f32.mrf.mxu1 }
 0x229   : > { %v1461_v12 = vadd.f32 %v1826_v40, %v1746_v59 }
 0x22a   : > { %v1748_v38 = vpop.f32.mrf.mxu0  ;;  %v1828_v39 = vpop.f32.mrf.mxu1 }
 0x22b   : > { %1491 = vst [vmem:[%s2675_s15 + $0x60] sm:$0xff] %v1461_v12  ;;  %v1749_v13 = vadd.f32 %v1748_v38, %v1747_v60  ;;  %v1829_v48 = vadd.f32 %v1828_v39, %v1827_v41 }
 0x22c   : > { %v1750_v10 = vpop.f32.mrf.mxu0  ;;  %v1830_v11 = vpop.f32.mrf.mxu1 }
 0x22d   : > { %v1466_v57 = vadd.f32 %v1829_v48, %v1749_v13 }
 0x22e   : > { %v1751_v58 = vpop.f32.mrf.mxu0  ;;  %v1831_v44 = vpop.f32.mrf.mxu1 }
 0x22f   : > { %1492 = vst [vmem:[%s2675_s15 + $0x68] sm:$0xff] %v1466_v57  ;;  %v1752_v46 = vadd.f32 %v1751_v58, %v1750_v10  ;;  %v1832_v45 = vadd.f32 %v1831_v44, %v1830_v11 }
 0x230   : > { %v1753_v16 = vpop.f32.mrf.mxu0  ;;  %v1833_v17 = vpop.f32.mrf.mxu1 }
 0x231   : > { %v1471_v47 = vadd.f32 %v1832_v45, %v1752_v46 }
 0x232   : > { %v1754_v14 = vpop.f32.mrf.mxu0  ;;  %v1834_v15 = vpop.f32.mrf.mxu1 }
 0x233   : > { %1493 = vst [vmem:[%s2675_s15 + $0x70] sm:$0xff] %v1471_v47  ;;  %v1755_v0 = vadd.f32 %v1754_v14, %v1753_v16  ;;  %v1835_v63 = vadd.f32 %v1834_v15, %v1833_v17 }
 0x235   : > { %v1476_v1 = vadd.f32 %v1835_v63, %v1755_v0 }
 0x237   : > { %1494 = vst [vmem:[%s2675_s15 + $0x78] sm:$0xff] %v1476_v1 }
 0x238   : > { %1930 = shalt.err (!%p1927_p0)
}
 0x239   : > { %s1931_s8 = scalar_lea.hbm %s2697_s30, 2048  ;;  %s1935_s11 = scalar_lea.hbm %s2749_s5, 4096 }
 0x23a   : > { %p1932_p1 = scmp.ne.s32.totalorder %s2697_s30, %s1931_s8  ;;  %p1936_p4 = scmp.lt.s32.totalorder %s2697_s30, %s2749_s5 }
 0x23b   : > { %p1937_p7 = scmp.lt.s32.totalorder %s1935_s11, %s1931_s8 }
 0x23c   : > { %p1933_p2 = pnand %p1932_p1, %p2058_p5 }
 0x23d   : > { %p1938_p6 = por %p1937_p7, %p1936_p4 }
 0x23e   : > { %p1934_p3 = pneg %p1933_p2 }
 0x240   : > { %p1939_p8 = pnand %p1938_p6, %p1934_p3 }
 0x242   : > { %1942 = shalt.err (!%p1939_p8)
}
 0x243   : > { %s1988_s15 = smov 128   ;;  %s1989_s16 = smov 8  }
 0x244   : > { %1840 = dma.vmem_to_hbm [thread:$0]  (%p2058_p5), %s2699_s23, 2048, %s2697_s30, %s2704_s22, %s1988_s15, %s1988_s15, %s1989_s16  }
 0x245 PF: > { %p1852_p9 = scmp.ge.s32.totalorder %s1981_s21, 2  ;;  %s1524_s25 = sand.u32 1, %s1969_s18  }
 0x246   : > { %p2781_p10 = scmp.ne.s32.totalorder %s2751_s29, 0  ;;  %s1525_s26 = scalar_lea.sflag [#allocation4], %s1524_s25 }
 0x248   : > { %p1847_p11 = pnand %p1852_p9, %p2781_p10 }
 0x24a   : > { %p1848_p12 = pneg %p1847_p11 }
 0x24c   : > { %1964 = dma.done.wait (%p1848_p12), %s1525_s26, 2048  }
 0x24d   : > { %1966 = vsyncadd (%p1848_p12), %s1525_s26, 4294965248  ;;  %p16_p13 = scmp.ge.s32.totalorder %s2045_s24, 4   ;;  %s2782_s18 = smov %s1973_s19 }
 0x24e   : > { %s2783_s19 = smov %s1977_s20  ;;  %s2784_s20 = smov %s2056_s27 }
 0x24f   : > { %s2785_s21 = smov %s2045_s24  ;;  %18 = sbr.rel (!%p16_p13) target bundleno = 4 (0x4), region = 83 }
 0x254   :  { %1530 = vsyncpa [#allocation3], 1 }
 0x255   :  { %1532 = vsyncpa [#allocation3 + $0x1], 1 }
 0x256   :  { %1533 = vsyncpa [#allocation4], 1 }
 0x257   :  { %1535 = vsyncpa [#allocation4 + $0x1], 1 }

</bundles_post_ra>
